<compile_context>
chip_gen: v7x
topology: tpu7x:2x2x1
jax: 0.10.0
libtpu: 0.0.40
codegen_flags: <defaults>
</compile_context>

<pallas_src>
import functools

import jax
import jax.numpy as jnp
from jax.experimental import pallas as pl
from jax.experimental.pallas import tpu as pltpu

_LANES = 128
_COLS = 512            # lane-dense last dim (multiple of 128)
_MAX_BLOCK_ROWS = 512  # 512x512 f32 = 1 MiB per input block


def _round_up(x, m):
    return ((x + m - 1) // m) * m


def _dice_partial_kernel(p_ref, t_ref, o_ref, *, use_sigmoid):
    # One (block_rows, _COLS) slab of preds/targets -> 3 partial sums.
    p = p_ref[...].astype(jnp.float32)
    if use_sigmoid:
        p = jax.nn.sigmoid(p)
    t = t_ref[...].astype(jnp.float32)

    s_pt = jnp.sum(p * t)
    s_p = jnp.sum(p)
    s_t = jnp.sum(t)

    # Write the three scalars into lanes 0/1/2 of a full (8, 128) tile so the
    # store is a plain unmasked vst (no (1,1) masked store, no serial carry).
    lane = jax.lax.broadcasted_iota(jnp.int32, (8, _LANES), 1)
    tile = jnp.where(
        lane == 0, s_pt,
        jnp.where(lane == 1, s_p, jnp.where(lane == 2, s_t, 0.0)),
    )
    o_ref[...] = tile.reshape(1, 8, _LANES)


def dice_loss(preds, targets, *, use_sigmoid=True, smooth=1e-5):
    assert preds.shape == targets.shape

    p_flat = preds.reshape(-1)
    t_flat = targets.reshape(-1)
    n = p_flat.size

    # Lane-dense 2-D layout with generation-friendly block sizes.
    cols = _COLS
    rows = pl.cdiv(n, cols)
    block_rows = min(_MAX_BLOCK_ROWS, _round_up(rows, 8))
    rows_padded = _round_up(rows, block_rows)
    total = rows_padded * cols
    pad = total - n
    if pad:
        # sigmoid(-1e30) == 0 exactly, so padded preds add nothing to sum(p);
        # padded targets are 0 so they add nothing to sum(t) or sum(p*t).
        pad_p = -1e30 if use_sigmoid else 0.0
        p_flat = jnp.pad(p_flat, (0, pad), constant_values=pad_p)
        t_flat = jnp.pad(t_flat, (0, pad), constant_values=0.0)
    p2d = p_flat.reshape(rows_padded, cols)
    t2d = t_flat.reshape(rows_padded, cols)

    num_blocks = rows_padded // block_rows

    kernel = functools.partial(_dice_partial_kernel, use_sigmoid=use_sigmoid)

    partials = pl.pallas_call(
        kernel,
        out_shape=jax.ShapeDtypeStruct((num_blocks, 8, _LANES), jnp.float32),
        grid_spec=pltpu.PrefetchScalarGridSpec(
            num_scalar_prefetch=0,
            grid=(num_blocks,),
            in_specs=[
                pl.BlockSpec((block_rows, cols), lambda i: (i, 0)),
                pl.BlockSpec((block_rows, cols), lambda i: (i, 0)),
            ],
            out_specs=pl.BlockSpec((1, 8, _LANES), lambda i: (i, 0, 0)),
        ),
        compiler_params=pltpu.CompilerParams(
            dimension_semantics=("parallel",),
            vmem_limit_bytes=32 * 1024 * 1024,
        ),
    )(p2d, t2d)

    # Tiny finalize in plain JAX: combine per-block partials, 1 - dice.
    sums = jnp.sum(partials[:, 0, :3], axis=0)
    s_pt, s_p, s_t = sums[0], sums[1], sums[2]
    dice = (2.0 * s_pt + smooth) / (s_p + s_t + smooth)
    return 1.0 - dice


def _reference(preds, targets, *, use_sigmoid=True, smooth=1e-5):
    p = jax.nn.sigmoid(preds) if use_sigmoid else preds
    t = targets
    dice = (2.0 * jnp.sum(p * t) + smooth) / (jnp.sum(p) + jnp.sum(t) + smooth)
    return 1.0 - dice


if __name__ == "__main__":
    key = jax.random.PRNGKey(0)
    kp, kt = jax.random.split(key)
    B, C, H, W = 2, 4, 16, 16
    preds = jax.random.normal(kp, (B, C, H, W), dtype=jnp.float32)
    targets = jax.random.bernoulli(kt, 0.5, (B, C, H, W)).astype(jnp.float32)

    loss = dice_loss(preds, targets)
    loss = jax.block_until_ready(loss)

    ref = _reference(preds, targets)
    assert jnp.allclose(loss, ref, atol=1e-5, rtol=1e-5), (loss, ref)
    print("KERNEL_OK")
</pallas_src>

<mosaic_0001>
module attributes {stable_mosaic.version = 11 : i64} {
  func.func @_dice_partial_kernel(%arg0: i32, %arg1: memref<8x512xf32, #tpu.memory_space<vmem>>, %arg2: memref<8x512xf32, #tpu.memory_space<vmem>>, %arg3: memref<1x8x128xf32, #tpu.memory_space<vmem>>) attributes {dimension_semantics = [#tpu.dimension_semantics<parallel>], iteration_bounds = array<i64: 1>, scalar_prefetch = 0 : i64, scratch_operands = 0 : i64, tpu.core_type = #tpu.core_type<tc>, window_params = [{transform_indices = @transform_0, window_bounds = array<i64: 8, 512>}, {transform_indices = @transform_1, window_bounds = array<i64: 8, 512>}, {transform_indices = @transform_2, window_bounds = array<i64: 1, 8, 128>}]} {
    %c0 = arith.constant 0 : index
    %c0_0 = arith.constant 0 : index
    %0 = vector.load %arg1[%c0, %c0_0] : memref<8x512xf32, #tpu.memory_space<vmem>>, vector<8x512xf32>
    %1 = arith.negf %0 : vector<8x512xf32>
    %2 = math.exp %1 : vector<8x512xf32>
    %cst = arith.constant 1.000000e+00 : f32
    %3 = vector.broadcast %cst : f32 to vector<8x512xf32>
    %4 = arith.addf %3, %2 : vector<8x512xf32>
    %5 = arith.divf %3, %4 : vector<8x512xf32>
    %c0_1 = arith.constant 0 : index
    %c0_2 = arith.constant 0 : index
    %6 = vector.load %arg2[%c0_1, %c0_2] : memref<8x512xf32, #tpu.memory_space<vmem>>, vector<8x512xf32>
    %7 = arith.mulf %5, %6 : vector<8x512xf32>
    %8 = vector.shape_cast %7 : vector<8x512xf32> to vector<1x8x512xf32>
    %cst_3 = arith.constant dense<0.000000e+00> : vector<1xf32>
    %9 = vector.multi_reduction <add>, %8, %cst_3 [1, 2] : vector<1x8x512xf32> to vector<1xf32>
    %10 = vector.shape_cast %9 : vector<1xf32> to vector<1x1x1xf32>
    %11 = vector.extract %10[0, 0, 0] : f32 from vector<1x1x1xf32>
    %12 = vector.shape_cast %5 : vector<8x512xf32> to vector<1x8x512xf32>
    %cst_4 = arith.constant dense<0.000000e+00> : vector<1xf32>
    %13 = vector.multi_reduction <add>, %12, %cst_4 [1, 2] : vector<1x8x512xf32> to vector<1xf32>
    %14 = vector.shape_cast %13 : vector<1xf32> to vector<1x1x1xf32>
    %15 = vector.extract %14[0, 0, 0] : f32 from vector<1x1x1xf32>
    %16 = vector.shape_cast %6 : vector<8x512xf32> to vector<1x8x512xf32>
    %cst_5 = arith.constant dense<0.000000e+00> : vector<1xf32>
    %17 = vector.multi_reduction <add>, %16, %cst_5 [1, 2] : vector<1x8x512xf32> to vector<1xf32>
    %18 = vector.shape_cast %17 : vector<1xf32> to vector<1x1x1xf32>
    %19 = vector.extract %18[0, 0, 0] : f32 from vector<1x1x1xf32>
    %20 = tpu.iota {dimensions = array<i32: 1>} : vector<8x128xi32>
    %c0_i32 = arith.constant 0 : i32
    %21 = vector.broadcast %c0_i32 : i32 to vector<8x128xi32>
    %22 = arith.cmpi eq, %20, %21 : vector<8x128xi32>
    %c1_i32 = arith.constant 1 : i32
    %23 = vector.broadcast %c1_i32 : i32 to vector<8x128xi32>
    %24 = arith.cmpi eq, %20, %23 : vector<8x128xi32>
    %c2_i32 = arith.constant 2 : i32
    %25 = vector.broadcast %c2_i32 : i32 to vector<8x128xi32>
    %26 = arith.cmpi eq, %20, %25 : vector<8x128xi32>
    %cst_6 = arith.constant 0.000000e+00 : f32
    %27 = vector.broadcast %19 : f32 to vector<8x128xf32>
    %28 = vector.broadcast %cst_6 : f32 to vector<8x128xf32>
    %29 = arith.select %26, %27, %28 : vector<8x128xi1>, vector<8x128xf32>
    %30 = vector.broadcast %15 : f32 to vector<8x128xf32>
    %31 = arith.select %24, %30, %29 : vector<8x128xi1>, vector<8x128xf32>
    %32 = vector.broadcast %11 : f32 to vector<8x128xf32>
    %33 = arith.select %22, %32, %31 : vector<8x128xi1>, vector<8x128xf32>
    %34 = vector.shape_cast %33 : vector<8x128xf32> to vector<1x8x128xf32>
    %c0_7 = arith.constant 0 : index
    %c0_8 = arith.constant 0 : index
    %c0_9 = arith.constant 0 : index
    %35 = vector.load %arg3[%c0_7, %c0_8, %c0_9] : memref<1x8x128xf32, #tpu.memory_space<vmem>>, vector<1x8x128xf32>
    tpu.vector_store %arg3[%c0_7, %c0_8, %c0_9], %34 {strides = array<i32>} : memref<1x8x128xf32, #tpu.memory_space<vmem>>, vector<1x8x128xf32>,
    return
  }
  func.func @transform_0(%arg0: i32) -> (i32, i32) {
    %c0_i32 = arith.constant 0 : i32
    %c0_i32_0 = arith.constant 0 : i32
    return %arg0, %c0_i32 : i32, i32
  }
  func.func @transform_1(%arg0: i32) -> (i32, i32) {
    %c0_i32 = arith.constant 0 : i32
    %c0_i32_0 = arith.constant 0 : i32
    return %arg0, %c0_i32 : i32, i32
  }
  func.func @transform_2(%arg0: i32) -> (i32, i32, i32) {
    %c0_i32 = arith.constant 0 : i32
    %c0_i32_0 = arith.constant 0 : i32
    %c0_i32_1 = arith.constant 0 : i32
    return %arg0, %c0_i32, %c0_i32_0 : i32, i32, i32
  }
}

</mosaic_0001>

<bundles_post_ra>
// kernel: tpu_custom_call.1
= control target key start
LH: loop header
LB: loop body
LE: loop exit
PB: predicated region body
PF: predicated region fallthrough
CT: control target
= control target key end

     0   :  { %7 = vsyncpa [#allocation3], 0  ;;  %s291_s0 = inlined_call_operand.hbm [shape: f32[8,512], index: 0, kind: input, shape index: {}]   ;;  %s292_s1 = inlined_call_operand.hbm [shape: f32[8,512], index: 1, kind: input, shape index: {}]   ;;  %s293_s2 = inlined_call_operand.hbm [shape: f32[1,8,128], index: 2, kind: output, shape index: {}]  }
   0x1   :  { %8 = vsyncpa [#allocation6], 0 }
   0x2   :  { %9 = vsyncpa [#allocation4], 0  ;;  %s237_s9 = smov [#allocation2]   ;;  %s238_s11 = smov [#allocation5]  }
   0x3   :  { %s16_s10 = sshll.u32 %s237_s9, 4  ;;  %s26_s12 = sshll.u32 %s238_s11, 4  ;;  %s17_s10 = int_to_ptr.vmem [resolvable:$true] %s16_s10  ;;  %s27_s12 = int_to_ptr.vmem [resolvable:$true] %s26_s12 }
   0x4   :  { %s165_s15 = scalar_lea.hbm %s291_s0, 512 }
   0x5   :  { %p166_p0 = scmp.ne.s32.totalorder %s291_s0, %s165_s15  ;;  %p169_p1 = scmp.lt.u32.totalorder %s165_s15, %s291_s0 }
   0x7   :  { %p171_p2 = pnand %p169_p1, %p166_p0 }
   0x9   :  { %174 = shalt.err (!%p171_p2)
}
   0xa   :  { %s175_s20 = scalar_lea.vmem %s17_s10, 512  ;;  %p180_p4 = scmp.lt.s32.totalorder %s17_s10, %s17_s10 }
   0xb   :  { %p176_p3 = scmp.ne.s32.totalorder %s17_s10, %s175_s20  ;;  %p181_p5 = scmp.lt.s32.totalorder %s175_s20, %s175_s20 }
   0xd   :  { %p182_p6 = por %p181_p5, %p180_p4 }
   0xf   :  { %p183_p7 = pnand %p182_p6, %p176_p3 }
  0x11   :  { %186 = shalt.err (!%p183_p7)
}
  0x12   :  { %19 = dma.hbm_to_vmem [thread:$0]  %s291_s0, 512, %s17_s10, [#allocation3]  }
  0x13   :  { %s187_s25 = scalar_lea.hbm %s292_s1, 512 }
  0x14   :  { %p188_p8 = scmp.ne.s32.totalorder %s292_s1, %s187_s25  ;;  %p191_p9 = scmp.lt.u32.totalorder %s187_s25, %s292_s1 }
  0x16   :  { %p193_p10 = pnand %p191_p9, %p188_p8 }
  0x18   :  { %196 = shalt.err (!%p193_p10)
}
  0x19   :  { %s197_s30 = scalar_lea.vmem %s27_s12, 512  ;;  %p202_p12 = scmp.lt.s32.totalorder %s27_s12, %s27_s12 }
  0x1a   :  { %p198_p11 = scmp.ne.s32.totalorder %s27_s12, %s197_s30  ;;  %p203_p13 = scmp.lt.s32.totalorder %s197_s30, %s197_s30 }
  0x1c   :  { %p204_p0 = por %p203_p13, %p202_p12 }
  0x1e   :  { %p205_p1 = pnand %p204_p0, %p198_p11 }
  0x20   :  { %208 = shalt.err (!%p205_p1)
}
  0x21   :  { %29 = dma.hbm_to_vmem [thread:$0]  %s292_s1, 512, %s27_s12, [#allocation6]  }
  0x22   :  { %231 = dma.done.wait [#allocation3], 512  }
  0x23   :  { %232 = vsyncadd [#allocation3], 4294966784 }
  0x24   :  { %233 = dma.done.wait [#allocation6], 512  }
  0x25   :  { %234 = vsyncadd [#allocation6], 4294966784  ;;  %v64_v0 = vld [vmem:[#allocation5] sm:$0xff]  ;;  %v65_v1 = vld [vmem:[#allocation5 + $0x8] sm:$0xff]  ;;  %v108_v58 = vlaneseq  ;;  %s239_s6 = smov [#allocation7]  }
  0x26   :  { %v66_v2 = vld [vmem:[#allocation5 + $0x10] sm:$0xff]  ;;  %v67_v3 = vld [vmem:[#allocation5 + $0x18] sm:$0xff]  ;;  %v96_v4 = vadd.f32 %v65_v1, %v64_v0  ;;  %v36_v5 = vld [vmem:[#allocation2] sm:$0xff]  ;;  %s126_s7 = sshll.u32 %s239_s6, 4  ;;  %s127_s7 = int_to_ptr.vmem [resolvable:$true] %s126_s7 }
  0x27   :  { %v37_v6 = vld [vmem:[#allocation2 + $0x8] sm:$0xff]  ;;  %v38_v7 = vld [vmem:[#allocation2 + $0x10] sm:$0xff]  ;;  %v39_v8 = vld [vmem:[#allocation2 + $0x18] sm:$0xff]  ;;  %v136_v9 = vmul.f32 -1.442695, %v36_v5  ;;  %v109_v59 = vand.u32 127, %v108_v58  ;;  %p214_p3 = scmp.lt.s32.totalorder %s127_s7, %s127_s7 }
  0x28   :  { %v137_v10 = vmul.f32 -1.442695, %v37_v6  ;;  %v97_v11 = vadd.f32 %v96_v4, %v66_v2  ;;  %v138_v12 = vmul.f32 -1.442695, %v38_v7  ;;  %v139_v13 = vmul.f32 -1.442695, %v39_v8 }
  0x29   :  { %149 = vpow2.f32 %v136_v9  ;;  %vm112_vm0 = vcmp.eq.s32.totalorder %v109_v59, 2  ;;  %vm111_vm1 = vcmp.eq.s32.totalorder %v109_v59, 1  ;;  %vm110_vm2 = vcmp.eq.s32.totalorder %v109_v59, 0  ;;  %s209_s8 = scalar_lea.vmem %s127_s7, 128 }
  0x2a   :  { %v98_v14 = vadd.f32 %v97_v11, %v67_v3  ;;  %151 = vpow2.f32 %v137_v10  ;;  %p210_p2 = scmp.ne.s32.totalorder %s127_s7, %s209_s8  ;;  %p215_p4 = scmp.lt.s32.totalorder %s209_s8, %s209_s8 }
  0x2b   :  { %153 = vpow2.f32 %v138_v12 }
  0x2c   :  { %99 = vadd.xlane.f32.xlu1 %v98_v14  ;;  %155 = vpow2.f32 %v139_v13  ;;  %p216_p5 = por %p215_p4, %p214_p3 }
  0x2e   :  { %p217_p6 = pnand %p216_p5, %p210_p2 }
  0x33   :  { %v150_v15 = vpop.eup %149 }
  0x34   :  { %v152_v16 = vpop.eup %151  ;;  %v52_v17 = vadd.f32 1.0, %v150_v15 }
  0x35   :  { %v154_v18 = vpop.eup %153  ;;  %v53_v19 = vadd.f32 1.0, %v152_v16 }
  0x36   :  { %v156_v20 = vpop.eup %155  ;;  %v54_v21 = vadd.f32 1.0, %v154_v18  ;;  %157 = vrcp.f32 %v52_v17 }
  0x37   :  { %v55_v22 = vadd.f32 1.0, %v156_v20  ;;  %159 = vrcp.f32 %v53_v19 }
  0x38   :  { %161 = vrcp.f32 %v54_v21 }
  0x39   :  { %163 = vrcp.f32 %v55_v22 }
  0x40   :  { %v158_v23 = vpop.eup %157 }
  0x41   :  { %v160_v24 = vpop.eup %159  ;;  %v68_v25 = vmul.f32 %v158_v23, %v64_v0 }
  0x42   :  { %v162_v26 = vpop.eup %161  ;;  %v69_v27 = vmul.f32 %v160_v24, %v65_v1  ;;  %v84_v28 = vadd.f32 %v160_v24, %v158_v23 }
  0x43   :  { %v164_v29 = vpop.eup %163  ;;  %v70_v30 = vmul.f32 %v162_v26, %v66_v2 }
  0x44   :  { %v71_v31 = vmul.f32 %v164_v29, %v67_v3  ;;  %v72_v32 = vadd.f32 %v69_v27, %v68_v25  ;;  %v85_v34 = vadd.f32 %v162_v26, %v84_v28 }
  0x46   :  { %v73_v33 = vadd.f32 %v72_v32, %v70_v30  ;;  %v86_v36 = vadd.f32 %v164_v29, %v85_v34 }
  0x48   :  { %v74_v35 = vadd.f32 %v73_v33, %v71_v31 }
  0x4a   :  { %75 = vadd.xlane.f32.xlu0 %v74_v35 }
  0x4e   :  { %87 = vadd.xlane.f32.xlu0 %v86_v36 }
  0xb9   :  { %v100_v37 = vpop.xlane.xlu1 %99 }
  0xba   :  { %v101_v38 = vrot.slane %v100_v37, 4 }
  0xbc   :  { %v102_v39 = vadd.f32 %v101_v38, %v100_v37 }
  0xbe   :  { %v103_v43 = vrot.slane %v102_v39, 2 }
  0xc0   :  { %v104_v49 = vadd.f32 %v103_v43, %v102_v39 }
  0xc2   :  { %v105_v54 = vrot.slane %v104_v49, 1 }
  0xc4   :  { %v106_v57 = vadd.f32 %v105_v54, %v104_v49 }
  0xd7   :  { %v76_v40 = vpop.xlane.xlu0 %75 }
  0xd8   :  { %v77_v41 = vrot.slane %v76_v40, 4 }
  0xda   :  { %v78_v42 = vadd.f32 %v77_v41, %v76_v40 }
  0xdb   :  { %v88_v44 = vpop.xlane.xlu0 %87 }
  0xdc   :  { %v79_v45 = vrot.slane %v78_v42, 2  ;;  %v89_v46 = vrot.slane %v88_v44, 4 }
  0xde   :  { %v90_v47 = vadd.f32 %v89_v46, %v88_v44  ;;  %v80_v48 = vadd.f32 %v79_v45, %v78_v42 }
  0xe0   :  { %v91_v50 = vrot.slane %v90_v47, 2  ;;  %v81_v51 = vrot.slane %v80_v48, 1 }
  0xe2   :  { %v92_v52 = vadd.f32 %v91_v50, %v90_v47  ;;  %v82_v53 = vadd.f32 %v81_v51, %v80_v48 }
  0xe4   :  { %140 = vpush %v82_v53  ;;  %v93_v55 = vrot.slane %v92_v52, 1 }
  0xe6   :  { %v94_v56 = vadd.f32 %v93_v55, %v92_v52 }
  0xe8   :  { %142 = vpush %v94_v56 }
  0xe9   :  { %144 = vpush %v106_v57 }
 0x115   :  { %s141_s1 = spop %140 }
 0x116   :  { %v117_v63 = vstv %s141_s1 }
 0x119   :  { %s143_s4 = spop %142 }
 0x11a   :  { %v115_v60 = vstv %s143_s4  ;;  %s145_s5 = spop %144 }
 0x11b   :  { %v113_v61 = vstv %s145_s5 }
 0x11c   :  { %v114_v62 = vsel %vm112_vm0, %v113_v61, 0.0 }
 0x11d   :  { %v116_v0 = vsel %vm111_vm1, %v115_v60, %v114_v62 }
 0x11e   :  { %v118_v1 = vsel %vm110_vm2, %v117_v63, %v116_v0 }
 0x11f   :  { %119 = vst [vmem:[#allocation7] sm:$0xff] %v118_v1 }
 0x120   :  { %220 = shalt.err (!%p217_p6)
}
 0x121   :  { %s221_s11 = scalar_lea.hbm %s293_s2, 128 }
 0x122   :  { %p222_p7 = scmp.ne.s32.totalorder %s293_s2, %s221_s11  ;;  %p225_p8 = scmp.lt.u32.totalorder %s221_s11, %s293_s2 }
 0x124   :  { %p227_p9 = pnand %p225_p8, %p222_p7 }
 0x126   :  { %230 = shalt.err (!%p227_p9)
}
 0x127   :  { %129 = dma.vmem_to_hbm [thread:$0]  %s127_s7, 128, %s293_s2, [#allocation4]  }
 0x128   :  { %235 = dma.done.wait [#allocation4], 128  }
 0x129   :  { %236 = vsyncadd [#allocation4], 4294967168 }
 0x12a   :  { %133 = vsyncpa [#allocation3], 1 }
 0x12b   :  { %134 = vsyncpa [#allocation6], 1 }
 0x12c   :  { %135 = vsyncpa [#allocation4], 1 }

</bundles_post_ra>
